<compile_context>
chip_gen: v6e
topology: v6e:2x2x1
jax: 0.10.0
libtpu: 0.0.40
codegen_flags: <defaults>
</compile_context>

<pallas_src>
import jax
import jax.numpy as jnp
from jax.experimental import pallas as pl
from jax.experimental.pallas import tpu as pltpu

_LANES = 128


def _round_up(a: int, m: int) -> int:
    return ((a + m - 1) // m) * m


def _tpu_config() -> tuple[int, int]:
    """(target block bytes, vmem_limit_bytes) per TPU generation."""
    try:
        kind = jax.devices()[0].device_kind.lower()
    except Exception:  # no device info -> conservative defaults
        kind = ""
    if "v7" in kind or "7x" in kind:
        # v7x: 3.2 TB/s HBM but only 64 MiB VMEM/TC -> 8 MiB blocks,
        # in+out double-buffered = 32 MiB, limit 48 MiB leaves headroom.
        return 8 * 1024 * 1024, 48 * 1024 * 1024
    # v5e / v6e: 4 MiB blocks; 16 MiB double-buffered < 32 MiB limit.
    return 4 * 1024 * 1024, 32 * 1024 * 1024


def _hswish_kernel(x_ref, o_ref):
    x = x_ref[...]
    # x * relu6(x + 3) / 6  ==  x * clamp(x + 3, 0, 6) * (1/6)
    r6 = jnp.clip(x + 3.0, 0.0, 6.0)
    o_ref[...] = (x * r6 * (1.0 / 6.0)).astype(o_ref.dtype)


def _hswish_jnp(x: jax.Array) -> jax.Array:
    """Weak-typed jnp HSwish (stays in x.dtype) for tiny tails/fallbacks."""
    return x * jnp.clip(x + 3.0, 0.0, 6.0) * (1.0 / 6.0)


def _hswish_slab(slab: jax.Array) -> jax.Array:
    """Run the Pallas kernel over a lane-dense 2-D slab (rows, width)."""
    rows, width = slab.shape
    dtype = slab.dtype
    block_bytes, vmem_limit = _tpu_config()

    bytes_per_row = width * jnp.dtype(dtype).itemsize
    # Multiple of 32 sublanes: legal tiling for f32 / bf16 / int8.
    target_rows = max(32, (max(32, block_bytes // bytes_per_row) // 32) * 32)

    if rows <= 32:
        # Tiny input: single full-extent block (always layout-legal).
        block_rows = rows
    else:
        # Guarantee >= 2 grid steps so both v7x TensorCores stream
        # ("parallel" axis is sharded across cores).
        half_rows = _round_up(pl.cdiv(rows, 2), 32)
        block_rows = min(target_rows, half_rows)

    grid_n = pl.cdiv(rows, block_rows)
    # Prefer an even number of steps (odd counts idle one v7x TC on the last
    # step).  alt <= block_rows, so VMEM use never grows.
    if grid_n > 2 and grid_n % 2 == 1:
        alt = _round_up(pl.cdiv(rows, grid_n + 1), 32)
        if alt >= 32 and pl.cdiv(rows, alt) % 2 == 0:
            block_rows = alt
            grid_n = pl.cdiv(rows, block_rows)

    n_elems = rows * width
    cost = pl.CostEstimate(
        flops=4 * n_elems,
        transcendentals=0,
        bytes_accessed=2 * n_elems * jnp.dtype(dtype).itemsize,
    )

    return pl.pallas_call(
        _hswish_kernel,
        out_shape=jax.ShapeDtypeStruct(slab.shape, dtype),
        grid_spec=pltpu.PrefetchScalarGridSpec(
            num_scalar_prefetch=0,
            grid=(grid_n,),
            in_specs=[pl.BlockSpec((block_rows, width), lambda i: (i, 0))],
            out_specs=pl.BlockSpec((block_rows, width), lambda i: (i, 0)),
        ),
        compiler_params=pltpu.CompilerParams(
            dimension_semantics=("parallel",),
            vmem_limit_bytes=vmem_limit,
        ),
        cost_estimate=cost,
    )(slab)


def hswish(x: jax.Array) -> jax.Array:
    """Elementwise HSwish via Pallas. Works for any shape / float dtype."""
    orig_shape = x.shape
    n = x.size
    if n == 0:
        return x

    n_aligned = (n // _LANES) * _LANES
    if n_aligned == 0:
        # Fewer than 128 elements: a kernel launch is pure overhead.
        return _hswish_jnp(x)

    # Widest lane-dense width that evenly divides the aligned element count
    # -> zero-copy reshape, unmasked 128k-wide stores.
    width = _LANES
    for w in (1024, 512, 256, 128):
        if n_aligned % w == 0:
            width = w
            break
    rows = n_aligned // width

    flat = jnp.ravel(x)

    if n_aligned == n:
        # Common CNN case: exact reshape, no extra HBM passes at all.
        out = _hswish_slab(flat.reshape(rows, width))
        return out.reshape(orig_shape)

    # Ragged case: kernel on the aligned prefix, plain jnp on the <128-element
    # tail, then stitch.  Avoids padding the whole input and slicing the whole
    # output (which tripled HBM traffic).
    prefix = flat[:n_aligned].reshape(rows, width)
    tail = flat[n_aligned:]
    out_prefix = _hswish_slab(prefix).reshape(-1)
    out_tail = _hswish_jnp(tail)
    return jnp.concatenate([out_prefix, out_tail]).reshape(orig_shape)


def hswish_ref(x: jax.Array) -> jax.Array:
    """Pure-JAX reference matching torch: x * relu6(x + 3) / 6."""
    return x * jnp.clip(x + 3.0, 0.0, 6.0) / 6.0


if __name__ == "__main__":
    key = jax.random.PRNGKey(0)

    # NCHW input consistent with a MobileNetV3 feature map (n % 128 == 0 path).
    x = jax.random.normal(key, (2, 4, 16, 16), dtype=jnp.float32) * 4.0
    y = hswish(x)
    jax.block_until_ready(y)
    assert y.shape == x.shape and y.dtype == x.dtype
    assert jnp.allclose(y, hswish_ref(x), atol=1e-6, rtol=1e-6), "mismatch (NCHW f32)"

    # bf16 path: compute stays bf16 end-to-end; compare loosely vs f32 ref.
    xb = (jax.random.normal(jax.random.PRNGKey(2), (2, 4, 16, 16)) * 4.0).astype(jnp.bfloat16)
    yb = hswish(xb)
    jax.block_until_ready(yb)
    assert yb.dtype == jnp.bfloat16
    assert jnp.allclose(
        yb.astype(jnp.float32), hswish_ref(xb.astype(jnp.float32)), atol=5e-2, rtol=5e-2
    ), "mismatch (bf16)"

    # Ragged size >= 128: exercises the aligned-prefix + jnp-tail stitch path.
    x3 = jax.random.normal(jax.random.PRNGKey(3), (3, 5, 19), dtype=jnp.float32) * 4.0
    y3 = hswish(x3)
    jax.block_until_ready(y3)
    assert jnp.allclose(y3, hswish_ref(x3), atol=1e-6, rtol=1e-6), "mismatch (ragged)"

    # Tiny tensor (< 128 elements): pure-jnp fallback path.
    x2 = jax.random.normal(jax.random.PRNGKey(1), (3, 5, 7), dtype=jnp.float32) * 4.0
    y2 = hswish(x2)
    jax.block_until_ready(y2)
    assert jnp.allclose(y2, hswish_ref(x2), atol=1e-6, rtol=1e-6), "mismatch (tiny)"

    print("KERNEL_OK")
</pallas_src>

<mosaic_0001>
module attributes {stable_mosaic.version = 11 : i64} {
  func.func @_hswish_kernel(%arg0: i32, %arg1: memref<2x1024xf32, #tpu.memory_space<vmem>>, %arg2: memref<2x1024xf32, #tpu.memory_space<vmem>>) attributes {dimension_semantics = [#tpu.dimension_semantics<parallel>], iteration_bounds = array<i64: 1>, scalar_prefetch = 0 : i64, scratch_operands = 0 : i64, tpu.core_type = #tpu.core_type<tc>, window_params = [{transform_indices = @transform_0, window_bounds = array<i64: 2, 1024>}, {transform_indices = @transform_1, window_bounds = array<i64: 2, 1024>}]} {
    %c0 = arith.constant 0 : index
    %c0_0 = arith.constant 0 : index
    %0 = vector.load %arg1[%c0, %c0_0] : memref<2x1024xf32, #tpu.memory_space<vmem>>, vector<2x1024xf32>
    %cst = arith.constant 3.000000e+00 : f32
    %1 = vector.broadcast %cst : f32 to vector<2x1024xf32>
    %2 = arith.addf %0, %1 : vector<2x1024xf32>
    %cst_1 = arith.constant 0.000000e+00 : f32
    %cst_2 = arith.constant 6.000000e+00 : f32
    %3 = vector.broadcast %cst_1 : f32 to vector<2x1024xf32>
    %4 = arith.maximumf %3, %2 : vector<2x1024xf32>
    %5 = vector.broadcast %cst_2 : f32 to vector<2x1024xf32>
    %6 = arith.minimumf %5, %4 : vector<2x1024xf32>
    %7 = arith.mulf %0, %6 : vector<2x1024xf32>
    %cst_3 = arith.constant 0.166666672 : f32
    %8 = vector.broadcast %cst_3 : f32 to vector<2x1024xf32>
    %9 = arith.mulf %7, %8 : vector<2x1024xf32>
    %c0_4 = arith.constant 0 : index
    %c0_5 = arith.constant 0 : index
    %10 = vector.load %arg2[%c0_4, %c0_5] : memref<2x1024xf32, #tpu.memory_space<vmem>>, vector<2x1024xf32>
    tpu.vector_store %arg2[%c0_4, %c0_5], %9 {strides = array<i32>} : memref<2x1024xf32, #tpu.memory_space<vmem>>, vector<2x1024xf32>,
    return
  }
  func.func @transform_0(%arg0: i32) -> (i32, i32) {
    %c0_i32 = arith.constant 0 : i32
    %c0_i32_0 = arith.constant 0 : i32
    return %arg0, %c0_i32 : i32, i32
  }
  func.func @transform_1(%arg0: i32) -> (i32, i32) {
    %c0_i32 = arith.constant 0 : i32
    %c0_i32_0 = arith.constant 0 : i32
    return %arg0, %c0_i32 : i32, i32
  }
}

</mosaic_0001>

<bundles_post_ra>
// kernel: tpu_custom_call.1
= control target key start
LH: loop header
LB: loop body
LE: loop exit
PB: predicated region body
PF: predicated region fallthrough
CT: control target
= control target key end

     0   :  { %6 = vsyncpa [#allocation3], 0  ;;  %s114_s0 = inlined_call_operand.hbm [shape: f32[2,1024], index: 0, kind: input, shape index: {}]   ;;  %s115_s1 = inlined_call_operand.hbm [shape: f32[2,1024], index: 1, kind: output, shape index: {}]  }
   0x1   :  { %7 = vsyncpa [#allocation4], 0  ;;  %s96_s6 = smov [#allocation2]  }
   0x2   :  { %s14_s7 = sshll.u32 %s96_s6, 4  ;;  %s15_s7 = int_to_ptr.vmem [resolvable:$true] %s14_s7 }
   0x3   :  { %s60_s8 = scalar_lea.vmem %s15_s7, 256  ;;  %p65_p1 = scmp.lt.s32.totalorder %s15_s7, %s15_s7 }
   0x4   :  { %p61_p0 = scmp.ne.s32.totalorder %s15_s7, %s60_s8  ;;  %p66_p2 = scmp.lt.s32.totalorder %s60_s8, %s60_s8 }
   0x6   :  { %p67_p3 = por %p66_p2, %p65_p1 }
   0x8   :  { %p68_p4 = pnand %p67_p3, %p61_p0 }
   0xa   :  { %71 = shalt.err (!%p68_p4)
}
   0xb   :  { %17 = dma.hbm_to_vmem [thread:$0]  %s114_s0, 256, %s15_s7, [#allocation3]  }
   0xc   :  { %92 = dma.done.wait [#allocation3], 256  }
   0xd   :  { %93 = vsyncadd [#allocation3], 4294967040  ;;  %v21_v0 = vld [vmem:[#allocation2] sm:$0xff]  ;;  %v22_v1 = vld [vmem:[#allocation2 + $0x8] sm:$0xff]  ;;  %s97_s11 = smov [#allocation5]  }
   0xe   :  { %v23_v2 = vadd.f32 3.0, %v21_v0  ;;  %v24_v3 = vadd.f32 3.0, %v22_v1  ;;  %s41_s12 = sshll.u32 %s97_s11, 4  ;;  %s42_s12 = int_to_ptr.vmem [resolvable:$true] %s41_s12 }
   0xf   :  { %s72_s0 = scalar_lea.vmem %s42_s12, 256  ;;  %p77_p6 = scmp.lt.s32.totalorder %s42_s12, %s42_s12 }
  0x10   :  { %v25_v4 = vmax.f32 %v23_v2, 0.0  ;;  %v26_v5 = vmax.f32 %v24_v3, 0.0  ;;  %p73_p5 = scmp.ne.s32.totalorder %s42_s12, %s72_s0  ;;  %p78_p7 = scmp.lt.s32.totalorder %s72_s0, %s72_s0 }
  0x12   :  { %v27_v6 = vmin.f32 %v25_v4, 6.0  ;;  %v28_v7 = vmin.f32 %v26_v5, 6.0  ;;  %p79_p8 = por %p78_p7, %p77_p6 }
  0x14   :  { %v29_v8 = vmul.f32 %v27_v6, %v21_v0  ;;  %v30_v9 = vmul.f32 %v28_v7, %v22_v1  ;;  %p80_p9 = pnand %p79_p8, %p73_p5 }
  0x16   :  { %v31_v10 = vmul.f32 0.16666667, %v29_v8  ;;  %v32_v11 = vmul.f32 0.16666667, %v30_v9 }
  0x18   :  { %33 = vst [vmem:[#allocation5] sm:$0xff] %v31_v10  ;;  %34 = vst [vmem:[#allocation5 + $0x8] sm:$0xff] %v32_v11 }
  0x19   :  { %83 = shalt.err (!%p80_p9)
}
  0x1a   :  { %44 = dma.vmem_to_hbm [thread:$0]  %s42_s12, 256, %s115_s1, [#allocation4]  }
  0x1b   :  { %94 = dma.done.wait [#allocation4], 256  }
  0x1c   :  { %95 = vsyncadd [#allocation4], 4294967040 }
  0x1d   :  { %48 = vsyncpa [#allocation3], 1 }
  0x1e   :  { %49 = vsyncpa [#allocation4], 1 }

</bundles_post_ra>
